<compile_context>
chip_gen: v7x
topology: tpu7x:2x2x1
jax: 0.10.0
libtpu: 0.0.40
codegen_flags: <defaults>
</compile_context>

<pallas_src>
import functools

import jax
import jax.numpy as jnp
from jax.experimental import pallas as pl
from jax.experimental.pallas import tpu as pltpu


# ------------------------------ kernels -------------------------------------


def _ffn_expert_kernel_resident(x_ref, wk_ref, wv_ref, o_ref):
    # x_ref:  (tm, H), wk_ref: (H, I), wv_ref: (I, H), o_ref: (tm, H)
    k = jnp.dot(x_ref[...], wk_ref[...], preferred_element_type=jnp.float32)  # MXU
    h = jnp.maximum(k, 0.0)                                                   # VPU
    h = h * h                                                                 # VPU
    o_ref[...] = jnp.dot(h.astype(wv_ref.dtype), wv_ref[...],
                         preferred_element_type=jnp.float32).astype(o_ref.dtype)


def _ffn_expert_kernel_tiled(x_ref, wk_ref, wv_ref, o_ref, acc_ref):
    # x_ref:  (tm, H)   token tile
    # wk_ref: (H, ti)   key-weight slice  (columns ti of the I axis)
    # wv_ref: (ti, H)   value-weight slice (rows ti of the I axis)
    # o_ref:  (tm, H)   output tile (revisited across the k axis)
    # acc_ref:(tm, H)   f32 accumulator scratch
    ki = pl.program_id(1)

    @pl.when(ki == 0)
    def _():
        acc_ref[...] = jnp.zeros_like(acc_ref)

    k = jnp.dot(x_ref[...], wk_ref[...], preferred_element_type=jnp.float32)  # MXU
    h = jnp.maximum(k, 0.0)                                                   # VPU
    h = h * h                                                                 # VPU
    acc_ref[...] += jnp.dot(h.astype(wv_ref.dtype), wv_ref[...],
                            preferred_element_type=jnp.float32)               # MXU

    @pl.when(ki == pl.num_programs(1) - 1)
    def _():
        o_ref[...] = acc_ref[...].astype(o_ref.dtype)


# --------------------------- tile selection ----------------------------------

_VMEM_BUDGET = 48 << 20  # conservative: fits v7x (64 MiB) and v5e/v6e (128 MiB)


def _tile_footprint_bytes(tm, ti, H, x_isz, w_isz, with_acc):
    # double-buffered x/out tiles + double-buffered weight slices (+ f32 acc)
    b = 2 * (2 * tm * H) * x_isz + 2 * (H * ti + ti * H) * w_isz
    if with_acc:
        b += tm * H * 4
    return int(b)


def _pick_intermediate_tile(I, H, tm, x_isz, w_isz, max_ti):
    """Largest lane-aligned divisor of I whose VMEM footprint fits the budget.

    ti == I (fully resident weights, fetched once per call) is preferred.
    """
    cands = sorted({t for t in range(128, I + 1, 128) if I % t == 0} | {I},
                   reverse=True)
    if max_ti is not None:
        capped = [t for t in cands if t <= max_ti]
        cands = capped if capped else [min(cands)]
    for ti in cands:
        if _tile_footprint_bytes(tm, ti, H, x_isz, w_isz,
                                 with_acc=(ti != I)) <= _VMEM_BUDGET:
            return ti
    return cands[-1]  # smallest candidate; let the compiler complain if huge


# ------------------------------ wrapper --------------------------------------


def prepare_weights(key_weight, value_weight):
    """One-time layout conversion from PyTorch nn.Linear layout.

    key_weight:   (I, H)  -> Wk (H, I)
    value_weight: (H, I)  -> Wv (I, H)
    Do this at parameter-init time, NOT per forward call.
    """
    return jnp.asarray(key_weight).T, jnp.asarray(value_weight).T


@functools.partial(jax.jit,
                   static_argnames=("token_tile", "max_intermediate_tile"))
def rwkv7_moe_ffn_expert(hidden, wk, wv, *, token_tile=256,
                         max_intermediate_tile=None):
    """hidden: (..., H).  wk: (H, I), wv: (I, H) (see prepare_weights).

    Returns value(relu(key(hidden))^2) with the same shape/dtype as `hidden`.
    """
    orig_shape = hidden.shape
    H = orig_shape[-1]
    I = wk.shape[1]
    assert wk.shape == (H, I), f"wk must be (H, I), got {wk.shape}"
    assert wv.shape == (I, H), f"wv must be (I, H), got {wv.shape}"

    x = hidden.reshape(-1, H)                      # (N, H), H on lanes
    N = x.shape[0]

    # Token tile: default 256, clamped to N; partial trailing blocks are fine
    # (output rows are masked on store).
    tm = min(int(token_tile), N)
    if tm < N:
        tm = max(8, (tm // 8) * 8)                 # sublane aligned when tiled

    x_isz = jnp.dtype(hidden.dtype).itemsize
    w_isz = jnp.dtype(wk.dtype).itemsize
    ti = _pick_intermediate_tile(I, H, tm, x_isz, w_isz, max_intermediate_tile)

    grid_m = pl.cdiv(N, tm)
    resident = (ti == I)

    footprint = _tile_footprint_bytes(tm, ti, H, x_isz, w_isz,
                                      with_acc=not resident)
    vmem_limit = min(footprint + (8 << 20), 56 << 20)

    cost = pl.CostEstimate(
        flops=4 * N * H * I,                       # two N*H*I matmuls
        transcendentals=0,
        bytes_accessed=2 * N * H * x_isz
        + (1 if resident else grid_m) * (2 * H * I) * w_isz,
    )

    if resident:
        # 1-D grid over tokens; weights DMA'd once (constant index_map).
        out = pl.pallas_call(
            _ffn_expert_kernel_resident,
            out_shape=jax.ShapeDtypeStruct((N, H), hidden.dtype),
            grid_spec=pltpu.PrefetchScalarGridSpec(
                num_scalar_prefetch=0,
                grid=(grid_m,),
                in_specs=[
                    pl.BlockSpec((tm, H), lambda i: (i, 0)),   # x tile
                    pl.BlockSpec((H, I), lambda i: (0, 0)),    # Wk (resident)
                    pl.BlockSpec((I, H), lambda i: (0, 0)),    # Wv (resident)
                ],
                out_specs=pl.BlockSpec((tm, H), lambda i: (i, 0)),
            ),
            compiler_params=pltpu.CompilerParams(
                dimension_semantics=("parallel",),
                vmem_limit_bytes=vmem_limit,
            ),
            cost_estimate=cost,
        )(x, wk, wv)
    else:
        grid_k = I // ti
        out = pl.pallas_call(
            _ffn_expert_kernel_tiled,
            out_shape=jax.ShapeDtypeStruct((N, H), hidden.dtype),
            grid_spec=pltpu.PrefetchScalarGridSpec(
                num_scalar_prefetch=0,
                grid=(grid_m, grid_k),
                in_specs=[
                    pl.BlockSpec((tm, H), lambda i, k: (i, 0)),   # x tile
                    pl.BlockSpec((H, ti), lambda i, k: (0, k)),   # Wk slice
                    pl.BlockSpec((ti, H), lambda i, k: (k, 0)),   # Wv slice
                ],
                out_specs=pl.BlockSpec((tm, H), lambda i, k: (i, 0)),
                scratch_shapes=[pltpu.VMEM((tm, H), jnp.float32)],
            ),
            compiler_params=pltpu.CompilerParams(
                dimension_semantics=("parallel", "arbitrary"),
                vmem_limit_bytes=vmem_limit,
            ),
            cost_estimate=cost,
        )(x, wk, wv)

    return out.reshape(orig_shape)


# ------------------------------ reference / test -----------------------------


def _reference(hidden, key_weight, value_weight):
    k = hidden @ key_weight.T
    h = jnp.maximum(k, 0.0) ** 2
    return h @ value_weight.T


if __name__ == "__main__":
    key = jax.random.PRNGKey(0)

    # ---- small config consistent with the module defaults ------------------
    # hidden_size=32 -> intermediate_size = int(32 * 3.5 // 32 * 32) = 96
    batch, seq, hidden_size = 2, 8, 32
    intermediate_size = int(hidden_size * 3.5 // 32 * 32)  # 96

    k_x, k_wk, k_wv, k_x2, k_wk2, k_wv2 = jax.random.split(key, 6)

    hidden = jax.random.normal(k_x, (batch, seq, hidden_size), dtype=jnp.float32)
    # PyTorch nn.Linear layout: (out_features, in_features)
    key_weight = jax.random.normal(
        k_wk, (intermediate_size, hidden_size), dtype=jnp.float32) * 0.02
    value_weight = jax.random.normal(
        k_wv, (hidden_size, intermediate_size), dtype=jnp.float32) * 0.02

    wk, wv = prepare_weights(key_weight, value_weight)   # one-time transpose
    out = jax.block_until_ready(rwkv7_moe_ffn_expert(hidden, wk, wv))
    ref = _reference(hidden, key_weight, value_weight)
    assert out.shape == hidden.shape
    assert jnp.allclose(out, ref, atol=1e-5, rtol=1e-5), "mismatch (small)"

    # ---- larger, lane/MXU-aligned config (weights-resident fast path) ------
    # H=256 -> I = int(256 * 3.5 // 32 * 32) = 896; tokens 2*384=768 -> tm=256.
    B2, T2, H2 = 2, 384, 256
    I2 = int(H2 * 3.5 // 32 * 32)  # 896
    hidden2 = jax.random.normal(k_x2, (B2, T2, H2), dtype=jnp.float32)
    key_weight2 = jax.random.normal(k_wk2, (I2, H2), dtype=jnp.float32) * 0.02
    value_weight2 = jax.random.normal(k_wv2, (H2, I2), dtype=jnp.float32) * 0.02

    wk2, wv2 = prepare_weights(key_weight2, value_weight2)
    out2 = jax.block_until_ready(rwkv7_moe_ffn_expert(hidden2, wk2, wv2))
    ref2 = _reference(hidden2, key_weight2, value_weight2)
    assert out2.shape == hidden2.shape
    assert jnp.allclose(out2, ref2, atol=1e-4, rtol=1e-4), "mismatch (resident)"

    # ---- same data, forced 2-D accumulator path (exercises k-tiling) -------
    out3 = jax.block_until_ready(
        rwkv7_moe_ffn_expert(hidden2, wk2, wv2, max_intermediate_tile=128))
    assert jnp.allclose(out3, ref2, atol=1e-4, rtol=1e-4), "mismatch (tiled)"

    print("KERNEL_OK")
</pallas_src>

<mosaic_0001>
module attributes {stable_mosaic.version = 11 : i64} {
  func.func @_ffn_expert_kernel_resident(%arg0: i32, %arg1: memref<16x32xf32, #tpu.memory_space<vmem>>, %arg2: memref<32x96xf32, #tpu.memory_space<vmem>>, %arg3: memref<96x32xf32, #tpu.memory_space<vmem>>, %arg4: memref<16x32xf32, #tpu.memory_space<vmem>>) attributes {dimension_semantics = [#tpu.dimension_semantics<parallel>], iteration_bounds = array<i64: 1>, scalar_prefetch = 0 : i64, scratch_operands = 0 : i64, tpu.core_type = #tpu.core_type<tc>, window_params = [{transform_indices = @transform_0, window_bounds = array<i64: 16, 32>}, {pipeline_mode = #tpu.pipeline_mode<synchronous>, transform_indices = @transform_1, window_bounds = array<i64: 32, 96>}, {pipeline_mode = #tpu.pipeline_mode<synchronous>, transform_indices = @transform_2, window_bounds = array<i64: 96, 32>}, {transform_indices = @transform_3, window_bounds = array<i64: 16, 32>}]} {
    %c0 = arith.constant 0 : index
    %c0_0 = arith.constant 0 : index
    %0 = vector.load %arg1[%c0, %c0_0] : memref<16x32xf32, #tpu.memory_space<vmem>>, vector<16x32xf32>
    %c0_1 = arith.constant 0 : index
    %c0_2 = arith.constant 0 : index
    %1 = vector.load %arg2[%c0_1, %c0_2] : memref<32x96xf32, #tpu.memory_space<vmem>>, vector<32x96xf32>
    %cst = arith.constant dense<0.000000e+00> : vector<16x96xf32>
    %2 = tpu.matmul %0, %1, %cst {dimension_numbers = #tpu.dot_dimension_numbers<[1], [0], [0], [1], [0, 0, 1, 1], [], []>} : vector<16x32xf32>, vector<32x96xf32>, vector<16x96xf32> -> vector<16x96xf32>
    %cst_3 = arith.constant 0.000000e+00 : f32
    %3 = vector.broadcast %cst_3 : f32 to vector<16x96xf32>
    %4 = arith.maximumf %2, %3 : vector<16x96xf32>
    %5 = arith.mulf %4, %4 : vector<16x96xf32>
    %c0_4 = arith.constant 0 : index
    %c0_5 = arith.constant 0 : index
    %6 = vector.load %arg3[%c0_4, %c0_5] : memref<96x32xf32, #tpu.memory_space<vmem>>, vector<96x32xf32>
    %cst_6 = arith.constant dense<0.000000e+00> : vector<16x32xf32>
    %7 = tpu.matmul %5, %6, %cst_6 {dimension_numbers = #tpu.dot_dimension_numbers<[1], [0], [0], [1], [0, 0, 1, 1], [], []>} : vector<16x96xf32>, vector<96x32xf32>, vector<16x32xf32> -> vector<16x32xf32>
    %c0_7 = arith.constant 0 : index
    %c0_8 = arith.constant 0 : index
    %8 = vector.load %arg4[%c0_7, %c0_8] : memref<16x32xf32, #tpu.memory_space<vmem>>, vector<16x32xf32>
    tpu.vector_store %arg4[%c0_7, %c0_8], %7 {strides = array<i32>} : memref<16x32xf32, #tpu.memory_space<vmem>>, vector<16x32xf32>,
    return
  }
  func.func @transform_0(%arg0: i32) -> (i32, i32) {
    %c0_i32 = arith.constant 0 : i32
    %c0_i32_0 = arith.constant 0 : i32
    return %arg0, %c0_i32 : i32, i32
  }
  func.func @transform_1(%arg0: i32) -> (i32, i32) {
    %c0_i32 = arith.constant 0 : i32
    %c0_i32_0 = arith.constant 0 : i32
    %c0_i32_1 = arith.constant 0 : i32
    return %c0_i32, %c0_i32_0 : i32, i32
  }
  func.func @transform_2(%arg0: i32) -> (i32, i32) {
    %c0_i32 = arith.constant 0 : i32
    %c0_i32_0 = arith.constant 0 : i32
    %c0_i32_1 = arith.constant 0 : i32
    return %c0_i32, %c0_i32_0 : i32, i32
  }
  func.func @transform_3(%arg0: i32) -> (i32, i32) {
    %c0_i32 = arith.constant 0 : i32
    %c0_i32_0 = arith.constant 0 : i32
    return %arg0, %c0_i32 : i32, i32
  }
}

</mosaic_0001>

<bundles_post_ra>
// kernel: rwkv7_moe_ffn_expert.1
= control target key start
LH: loop header
LB: loop body
LE: loop exit
PB: predicated region body
PF: predicated region fallthrough
CT: control target
= control target key end

     0   :  { %vm21_vm0 = vcmask 261120   ;;  %s433_s0 = inlined_call_operand.vmem [shape: f32[16,32], index: 0, kind: input, shape index: {}]   ;;  %s434_s1 = inlined_call_operand.vmem [shape: f32[32,96], index: 1, kind: input, shape index: {}]   ;;  %s435_s2 = inlined_call_operand.vmem [shape: f32[96,32], index: 2, kind: input, shape index: {}]   ;;  %s436_s3 = inlined_call_operand.hbm [shape: f32[16,32], index: 3, kind: output, shape index: {}]  }
   0x1   :  { %v17_v0 = vld [vmem:[%s434_s1] sm:$0xff]  ;;  %v18_v1 = vld [vmem:[%s434_s1 + $0x8] sm:$0xff]  ;;  %v19_v2 = vld [vmem:[%s434_s1 + $0x10] sm:$0xff] }
   0x2   :  { %v281_v3 = vpack.c.bf16 %v18_v1, %v17_v0  ;;  %v20_v4 = vld [vmem:[%s434_s1 + $0x18] sm:$0xff]  ;;  %v15_v5 = vld [vmem:[%s433_s0] sm:$0xff]  ;;  %v108_v8 = vld [vmem:[%s435_s2 + $0x8] sm:$0xff] }
   0x3   :  { %v285_v6 = vpack.c.bf16 %v20_v4, %v19_v2  ;;  %251 = vmatprep.mubr.msk.f32.mxu0 %vm21_vm0, %v15_v5  ;;  %v107_v7 = vld [vmem:[%s435_s2] sm:$0xff]  ;;  %v109_v9 = vld [vmem:[%s435_s2 + $0x10] sm:$0xff]  ;;  %v110_v11 = vld [vmem:[%s435_s2 + $0x18] sm:$0xff] }
   0x4   :  { %282 = vmatprep.subr.bf16.mxu0 %v281_v3  ;;  %v289_v10 = vpack.c.bf16 %v108_v8, %v107_v7  ;;  %v293_v12 = vpack.c.bf16 %v110_v11, %v109_v9  ;;  %v111_v13 = vld [vmem:[%s435_s2 + $0x20] sm:$0xff]  ;;  %v112_v14 = vld [vmem:[%s435_s2 + $0x28] sm:$0xff] }
   0x5   :  { %284 = vmatpush3.bf16.msra.mxu0 %v281_v3 }
   0x6   :  { %286 = vmatprep.subr.bf16.mxu0 %v285_v6  ;;  %290 = vmatprep.subr.bf16.mxu1 %v289_v10 }
   0x7   :  { %8 = vsyncpa [#allocation3], 0  ;;  %292 = vmatpush3.bf16.msra.mxu1 %v289_v10  ;;  %v297_v15 = vpack.c.bf16 %v112_v14, %v111_v13  ;;  %v16_v16 = vld [vmem:[%s433_s0 + $0x8] sm:$0xff]  ;;  %v113_v17 = vld [vmem:[%s435_s2 + $0x30] sm:$0xff]  ;;  %vm119_vm1 = vcmask 785408   ;;  %s340_s19 = smov [#allocation2]  }
   0x8   :  { %294 = vmatprep.subr.bf16.mxu1 %v293_v12  ;;  %v114_v18 = vld [vmem:[%s435_s2 + $0x38] sm:$0xff]  ;;  %v115_v20 = vld [vmem:[%s435_s2 + $0x40] sm:$0xff]  ;;  %v116_v21 = vld [vmem:[%s435_s2 + $0x48] sm:$0xff]  ;;  %s208_s20 = sshll.u32 %s340_s19, 4  ;;  %s209_s20 = int_to_ptr.vmem [resolvable:$true] %s208_s20 }
   0x9   :  { %288 = vmatpush3.bf16.msra.mxu0 %v285_v6  ;;  %v301_v19 = vpack.c.bf16 %v114_v18, %v113_v17  ;;  %v305_v22 = vpack.c.bf16 %v116_v21, %v115_v20  ;;  %v117_v23 = vld [vmem:[%s435_s2 + $0x50] sm:$0xff]  ;;  %v118_v24 = vld [vmem:[%s435_s2 + $0x58] sm:$0xff]  ;;  %s316_s2 = scalar_lea.vmem %s209_s20, 256  ;;  %p321_p1 = scmp.lt.s32.totalorder %s209_s20, %s209_s20 }
   0xa   :  { %v309_v25 = vpack.c.bf16 %v118_v24, %v117_v23  ;;  %p317_p0 = scmp.ne.s32.totalorder %s209_s20, %s316_s2  ;;  %p322_p2 = scmp.lt.s32.totalorder %s316_s2, %s316_s2 }
   0xb   :  { %296 = vmatpush3.bf16.msra.mxu1 %v293_v12 }
   0xc   :  { %252 = vmatmul.mubr.msk.f32.vlgmr.msra.gmra.mrb[0].mxu0 %vm21_vm0, %v16_v16  ;;  %298 = vmatprep.subr.bf16.mxu1 %v297_v15  ;;  %p323_p3 = por %p322_p2, %p321_p1 }
   0xe   :  { %p324_p4 = pnand %p323_p3, %p317_p0 }
   0xf   :  { %300 = vmatpush3.bf16.msra.mxu1 %v297_v15 }
  0x10   :  { %302 = vmatprep.subr.bf16.mxu1 %v301_v19 }
  0x13   :  { %304 = vmatpush3.bf16.msra.mxu1 %v301_v19 }
  0x14   :  { %306 = vmatprep.subr.bf16.mxu1 %v305_v22 }
  0x17   :  { %308 = vmatpush3.bf16.msra.mxu1 %v305_v22 }
  0x18   :  { %310 = vmatprep.subr.bf16.mxu1 %v309_v25 }
  0x1b   :  { %312 = vmatpush3.bf16.msra.mxu1 %v309_v25 }
  0xdf   :  { %v253_v26 = vpop.f32.mrb[0].mxu0 }
  0xe0   :  { %v104_v27 = vmax.f32 %v253_v26, 0.0  ;;  %v94_v28 = vpop.f32.mrb[1].mxu0 }
  0xe1   :  { %v103_v29 = vmax.f32 %v94_v28, 0.0 }
  0xe2   :  { %v106_v31 = vmul.f32 %v104_v27, %v104_v27 }
  0xe3   :  { %v105_v30 = vmul.f32 %v103_v29, %v103_v29 }
  0xe5   :  { %278 = vmatprep.mubr.msk.f32.mxu1 %vm119_vm1, %v105_v30 }
  0xe6   :  { %279 = vmatmul.mubr.msk.f32.vlgmr.msra.gmra.mrb[0].mxu1 %vm119_vm1, %v106_v31 }
 0x1b9   :  { %v280_v32 = vpop.f32.mrb[0].mxu1 }
 0x1ba   :  { %202 = vst.msk [vmem:[#allocation2 + $0x8] sm:$0xff] %vm21_vm0, %v280_v32  ;;  %v192_v33 = vpop.f32.mrb[1].mxu1 }
 0x1bb   :  { %201 = vst.msk [vmem:[#allocation2] sm:$0xff] %vm21_vm0, %v192_v33 }
 0x1bc   :  { %327 = shalt.err (!%p324_p4)
}
 0x1bd   :  { %s328_s23 = scalar_lea.hbm %s436_s3, 256 }
 0x1be   :  { %p329_p5 = scmp.ne.s32.totalorder %s436_s3, %s328_s23  ;;  %p332_p6 = scmp.lt.u32.totalorder %s328_s23, %s436_s3 }
 0x1c0   :  { %p334_p7 = pnand %p332_p6, %p329_p5 }
 0x1c2   :  { %337 = shalt.err (!%p334_p7)
}
 0x1c3   :  { %s341_s1 = smov 128   ;;  %s342_s28 = smov 8  }
 0x1c4   :  { %214 = dma.vmem_to_hbm [thread:$0]  %s209_s20, 256, %s436_s3, [#allocation3], %s341_s1, %s341_s1, %s342_s28  }
 0x1c5   :  { %338 = dma.done.wait [#allocation3], 256  }
 0x1c6   :  { %339 = vsyncadd [#allocation3], 4294967040 }
 0x1c7   :  { %218 = vsyncpa [#allocation3], 1 }

</bundles_post_ra>
